<compile_context>
chip_gen: v5e
topology: v5e:2x2
jax: 0.10.0
libtpu: 0.0.40
codegen_flags: <defaults>
</compile_context>

<pallas_src>
import math

import jax
import jax.numpy as jnp
from jax.experimental import pallas as pl
from jax.experimental.pallas import tpu as pltpu

# softplus^{-1}(1): padding rho with this makes sigma == 1, so padded entries
# contribute exactly 0 KL and (with mu = eps = 0) sample to exactly 0.
_RHO_IDENTITY = math.log(math.e - 1.0)


def _softplus(x):
    # numerically stable softplus: max(x, 0) + log1p(exp(-|x|))
    return jnp.maximum(x, 0.0) + jnp.log1p(jnp.exp(-jnp.abs(x)))


# ---------------------------------------------------------------------------
# Pass 1: fused weight/bias sampling + KL reduction.
# Streams (wmu, wrho, eps_w) exactly once; emits sampled W, sampled bias and
# the scalar KL.  Grid is (N tiles, K tiles) with K innermost.
# ---------------------------------------------------------------------------
def _sample_kl_kernel(wmu_ref, wrho_ref, epsw_ref, bmu_ref, brho_ref,
                      epsb_ref, w_ref, b_ref, kl_ref, acc_ref):
    j = pl.program_id(0)          # N tiles (outer)
    i = pl.program_id(1)          # K tiles (inner)

    @pl.when(jnp.logical_and(j == 0, i == 0))
    def _():
        acc_ref[...] = jnp.zeros_like(acc_ref)

    wmu = wmu_ref[...]
    wrho = wrho_ref[...]
    wsig = _softplus(wrho)                                   # one EUP pass
    w_ref[...] = wmu + wsig * epsw_ref[...]                  # sampled weights

    # log(sigma) derived from the softplus already computed.
    log_wsig = jnp.where(wrho < -20.0, wrho, jnp.log(wsig))
    term = -log_wsig + 0.5 * (wsig * wsig + wmu * wmu) - 0.5   # (tk, tn)
    tk, tn = term.shape
    # Partial reduce with pure VPU (vreg elementwise) adds into (8, tn);
    # the single cross-lane reduction happens only at the last grid step.
    acc_ref[...] += term.reshape(tk // 8, 8, tn).sum(axis=0)

    # Sampled bias: written unconditionally (cheap) so the resident (0, j)
    # output block always holds valid data when it is flushed.
    bmu = bmu_ref[...]
    brho = brho_ref[...]
    bsig = _softplus(brho)
    b_ref[...] = bmu + bsig * epsb_ref[...]

    @pl.when(i == 0)   # count the bias KL exactly once per N tile
    def _():
        log_bsig = jnp.where(brho < -20.0, brho, jnp.log(bsig))
        bterm = -log_bsig + 0.5 * (bsig * bsig + bmu * bmu) - 0.5   # (1, tn)
        acc_ref[0:1, :] += bterm

    @pl.when(jnp.logical_and(j == pl.num_programs(0) - 1,
                             i == pl.num_programs(1) - 1))
    def _():
        kl_ref[...] = jnp.sum(acc_ref[...]).reshape(1, 1)


# ---------------------------------------------------------------------------
# Pass 2: plain tiled matmul on the pre-sampled weights (canonical (M,K)@(K,N)
# on the MXU, f32 resident accumulator, K innermost).
# ---------------------------------------------------------------------------
def _linear_kernel(x_ref, w_ref, b_ref, out_ref, acc_ref):
    k = pl.program_id(2)

    @pl.when(k == 0)
    def _():
        acc_ref[...] = jnp.zeros_like(acc_ref)

    acc_ref[...] += jnp.dot(x_ref[...], w_ref[...],
                            preferred_element_type=jnp.float32)

    @pl.when(k == pl.num_programs(2) - 1)
    def _():
        out_ref[...] = (acc_ref[...] + b_ref[...]).astype(out_ref.dtype)


def _round_up(n, m):
    return (n + m - 1) // m * m


def bayes_linear(x, weight_mu, weight_rho, bias_mu, bias_rho, eps_w, eps_b,
                 *, tm=512, tn=512, tk=512):
    """Forward pass of BayesLinear: returns (output, kl)."""
    *lead, in_features = x.shape
    out_features = weight_mu.shape[0]

    x2d = x.reshape(-1, in_features).astype(jnp.float32)
    M, K, N = x2d.shape[0], in_features, out_features

    # Tile sizes: cap at the requested tile (~8 MiB of double-buffered VMEM at
    # 512/512/512 — well under v7x's 64 MiB), shrink to the (8,128)-aligned
    # padded problem size when the problem is smaller than one tile.
    tm = min(tm, _round_up(M, 8))
    tn = min(tn, _round_up(N, 128))
    tk = min(tk, _round_up(K, 128))

    # v7x has 2 TensorCores: if both parallel axes would collapse to a single
    # tile, split the N axis (best effort) so both cores get work.
    if _round_up(M, tm) // tm == 1 and _round_up(N, tn) // tn == 1:
        n128 = _round_up(N, 128) // 128
        if n128 >= 2:
            tn = ((n128 + 1) // 2) * 128

    Mp, Kp, Np = _round_up(M, tm), _round_up(K, tk), _round_up(N, tn)
    nm, nn, nk = Mp // tm, Np // tn, Kp // tk

    def pad2d(a, rows, cols, val):
        a = a.astype(jnp.float32)
        return jnp.pad(a, ((0, rows - a.shape[0]), (0, cols - a.shape[1])),
                       constant_values=val)

    xp     = pad2d(x2d,            Mp, Kp, 0.0)
    wmu_t  = pad2d(weight_mu.T,    Kp, Np, 0.0)            # (K, N): canonical
    wrho_t = pad2d(weight_rho.T,   Kp, Np, _RHO_IDENTITY)  # MXU orientation
    epsw_t = pad2d(eps_w.T,        Kp, Np, 0.0)
    bmu    = pad2d(bias_mu.reshape(1, N),  1, Np, 0.0)
    brho   = pad2d(bias_rho.reshape(1, N), 1, Np, _RHO_IDENTITY)
    epsb   = pad2d(eps_b.reshape(1, N),    1, Np, 0.0)

    # ---- Pass 1: fused sample + KL (single stream over the weights) --------
    w_sampled, b_sampled, kl = pl.pallas_call(
        _sample_kl_kernel,
        out_shape=(jax.ShapeDtypeStruct((Kp, Np), jnp.float32),
                   jax.ShapeDtypeStruct((1, Np), jnp.float32),
                   jax.ShapeDtypeStruct((1, 1), jnp.float32)),
        grid_spec=pltpu.PrefetchScalarGridSpec(
            num_scalar_prefetch=0,
            grid=(nn, nk),                                     # K innermost
            in_specs=[
                pl.BlockSpec((tk, tn), lambda j, i: (i, j)),   # weight_mu^T
                pl.BlockSpec((tk, tn), lambda j, i: (i, j)),   # weight_rho^T
                pl.BlockSpec((tk, tn), lambda j, i: (i, j)),   # eps_w^T
                pl.BlockSpec((1, tn),  lambda j, i: (0, j)),   # bias_mu
                pl.BlockSpec((1, tn),  lambda j, i: (0, j)),   # bias_rho
                pl.BlockSpec((1, tn),  lambda j, i: (0, j)),   # eps_b
            ],
            out_specs=[
                pl.BlockSpec((tk, tn), lambda j, i: (i, j)),   # sampled W
                pl.BlockSpec((1, tn),  lambda j, i: (0, j)),   # sampled bias
                pl.BlockSpec((1, 1),   lambda j, i: (0, 0)),   # KL scalar
            ],
            scratch_shapes=[pltpu.VMEM((8, tn), jnp.float32)],
        ),
        compiler_params=pltpu.CompilerParams(
            dimension_semantics=("arbitrary", "arbitrary"),
            vmem_limit_bytes=48 * 1024 * 1024,
        ),
        cost_estimate=pl.CostEstimate(
            flops=8 * Kp * Np,
            transcendentals=3 * Kp * Np,
            bytes_accessed=4 * (4 * Kp * Np + 4 * Np * nk + 1),
        ),
    )(wmu_t, wrho_t, epsw_t, bmu, brho, epsb)

    # ---- Pass 2: tiled matmul + bias on pre-sampled weights ----------------
    out = pl.pallas_call(
        _linear_kernel,
        out_shape=jax.ShapeDtypeStruct((Mp, Np), jnp.float32),
        grid_spec=pltpu.PrefetchScalarGridSpec(
            num_scalar_prefetch=0,
            grid=(nm, nn, nk),
            in_specs=[
                pl.BlockSpec((tm, tk), lambda i, j, k: (i, k)),   # x
                pl.BlockSpec((tk, tn), lambda i, j, k: (k, j)),   # sampled W
                pl.BlockSpec((1, tn),  lambda i, j, k: (0, j)),   # sampled b
            ],
            out_specs=pl.BlockSpec((tm, tn), lambda i, j, k: (i, j)),
            scratch_shapes=[pltpu.VMEM((tm, tn), jnp.float32)],
        ),
        compiler_params=pltpu.CompilerParams(
            dimension_semantics=("parallel", "parallel", "arbitrary"),
            vmem_limit_bytes=48 * 1024 * 1024,
        ),
        cost_estimate=pl.CostEstimate(
            flops=2 * Mp * Kp * Np + Mp * Np,
            transcendentals=0,
            bytes_accessed=4 * (Mp * Kp * nn + Kp * Np * nm
                                + Np * nm * nn + Mp * Np),
        ),
    )(xp, w_sampled, b_sampled)

    out = out[:M, :N].reshape(*lead, out_features)
    return out, kl[0, 0]


if __name__ == "__main__":
    # Small shapes consistent with a linear layer: hidden=32 -> out=16
    in_features, out_features = 32, 16
    batch, seq = 2, 8

    # Deterministic parameter init per BayesLinear.__init__
    weight_mu = jnp.zeros((out_features, in_features), jnp.float32)
    weight_rho = jnp.full((out_features, in_features), -4.0, jnp.float32)
    bias_mu = jnp.zeros((out_features,), jnp.float32)
    bias_rho = jnp.full((out_features,), -4.0, jnp.float32)

    key = jax.random.PRNGKey(0)
    kx, kw, kb = jax.random.split(key, 3)
    x = jax.random.normal(kx, (batch, seq, in_features), jnp.float32)
    eps_w = jax.random.normal(kw, (out_features, in_features), jnp.float32)
    eps_b = jax.random.normal(kb, (out_features,), jnp.float32)

    out, kl = bayes_linear(x, weight_mu, weight_rho, bias_mu, bias_rho,
                           eps_w, eps_b)
    jax.block_until_ready((out, kl))

    # Reference check in plain JAX (same eps, same math)
    wsig = jnp.log1p(jnp.exp(weight_rho))
    bsig = jnp.log1p(jnp.exp(bias_rho))
    w = weight_mu + wsig * eps_w
    b = bias_mu + bsig * eps_b
    ref_out = x @ w.T + b
    ref_kl = (jnp.sum(-jnp.log(wsig) + 0.5 * (wsig ** 2 + weight_mu ** 2) - 0.5)
              + jnp.sum(-jnp.log(bsig) + 0.5 * (bsig ** 2 + bias_mu ** 2) - 0.5))

    assert out.shape == (batch, seq, out_features)
    assert jnp.allclose(out, ref_out, atol=1e-4, rtol=1e-4), "output mismatch"
    assert jnp.allclose(kl, ref_kl, atol=1e-2, rtol=1e-4), "kl mismatch"

    print("KERNEL_OK")
</pallas_src>

<mosaic_0001>
module attributes {stable_mosaic.version = 11 : i64} {
  func.func @_sample_kl_kernel(%arg0: i32, %arg1: i32, %arg2: memref<128x128xf32, #tpu.memory_space<vmem>>, %arg3: memref<128x128xf32, #tpu.memory_space<vmem>>, %arg4: memref<128x128xf32, #tpu.memory_space<vmem>>, %arg5: memref<1x128xf32, #tpu.memory_space<vmem>>, %arg6: memref<1x128xf32, #tpu.memory_space<vmem>>, %arg7: memref<1x128xf32, #tpu.memory_space<vmem>>, %arg8: memref<128x128xf32, #tpu.memory_space<vmem>>, %arg9: memref<1x128xf32, #tpu.memory_space<vmem>>, %arg10: memref<1x1xf32, #tpu.memory_space<vmem>>, %arg11: memref<8x128xf32, #tpu.memory_space<vmem>>) attributes {dimension_semantics = [#tpu.dimension_semantics<arbitrary>, #tpu.dimension_semantics<arbitrary>], iteration_bounds = array<i64: 1, 1>, scalar_prefetch = 0 : i64, scratch_operands = 1 : i64, tpu.core_type = #tpu.core_type<tc>, window_params = [{transform_indices = @transform_0, window_bounds = array<i64: 128, 128>}, {transform_indices = @transform_1, window_bounds = array<i64: 128, 128>}, {transform_indices = @transform_2, window_bounds = array<i64: 128, 128>}, {transform_indices = @transform_3, window_bounds = array<i64: 1, 128>}, {transform_indices = @transform_4, window_bounds = array<i64: 1, 128>}, {transform_indices = @transform_5, window_bounds = array<i64: 1, 128>}, {transform_indices = @transform_6, window_bounds = array<i64: 128, 128>}, {transform_indices = @transform_7, window_bounds = array<i64: 1, 128>}, {pipeline_mode = #tpu.pipeline_mode<synchronous>, transform_indices = @transform_8, window_bounds = array<i64: 1, 1>}]} {
    %c0_i32 = arith.constant 0 : i32
    %0 = arith.cmpi eq, %arg0, %c0_i32 : i32
    %c0_i32_0 = arith.constant 0 : i32
    %1 = arith.cmpi eq, %arg1, %c0_i32_0 : i32
    %2 = arith.andi %0, %1 : i1
    %3 = arith.extui %2 : i1 to i32
    %c0_i32_1 = arith.constant 0 : i32
    %4 = arith.cmpi ne, %3, %c0_i32_1 : i32
    scf.if %4 {
      %cst_34 = arith.constant 0.000000e+00 : f32
      %60 = vector.broadcast %cst_34 : f32 to vector<8x128xf32>
      %c0_35 = arith.constant 0 : index
      %c0_36 = arith.constant 0 : index
      %61 = vector.load %arg11[%c0_35, %c0_36] : memref<8x128xf32, #tpu.memory_space<vmem>>, vector<8x128xf32>
      tpu.vector_store %arg11[%c0_35, %c0_36], %60 {strides = array<i32>} : memref<8x128xf32, #tpu.memory_space<vmem>>, vector<8x128xf32>,
    } else {
    }
    %c0 = arith.constant 0 : index
    %c0_2 = arith.constant 0 : index
    %5 = vector.load %arg2[%c0, %c0_2] : memref<128x128xf32, #tpu.memory_space<vmem>>, vector<128x128xf32>
    %c0_3 = arith.constant 0 : index
    %c0_4 = arith.constant 0 : index
    %6 = vector.load %arg3[%c0_3, %c0_4] : memref<128x128xf32, #tpu.memory_space<vmem>>, vector<128x128xf32>
    %cst = arith.constant 0.000000e+00 : f32
    %7 = vector.broadcast %cst : f32 to vector<128x128xf32>
    %8 = arith.maximumf %6, %7 : vector<128x128xf32>
    %9 = math.absf %6 : vector<128x128xf32>
    %cst_5 = arith.constant 0.000000e+00 : f32
    %10 = vector.broadcast %cst_5 : f32 to vector<128x128xf32>
    %11 = arith.subf %10, %9 : vector<128x128xf32>
    %12 = math.exp %11 : vector<128x128xf32>
    %13 = math.log1p %12 : vector<128x128xf32>
    %14 = arith.addf %8, %13 : vector<128x128xf32>
    %c0_6 = arith.constant 0 : index
    %c0_7 = arith.constant 0 : index
    %15 = vector.load %arg4[%c0_6, %c0_7] : memref<128x128xf32, #tpu.memory_space<vmem>>, vector<128x128xf32>
    %16 = arith.mulf %14, %15 : vector<128x128xf32>
    %17 = arith.addf %5, %16 : vector<128x128xf32>
    %c0_8 = arith.constant 0 : index
    %c0_9 = arith.constant 0 : index
    %18 = vector.load %arg8[%c0_8, %c0_9] : memref<128x128xf32, #tpu.memory_space<vmem>>, vector<128x128xf32>
    tpu.vector_store %arg8[%c0_8, %c0_9], %17 {strides = array<i32>} : memref<128x128xf32, #tpu.memory_space<vmem>>, vector<128x128xf32>,
    %cst_10 = arith.constant -2.000000e+01 : f32
    %19 = vector.broadcast %cst_10 : f32 to vector<128x128xf32>
    %20 = arith.cmpf olt, %6, %19 : vector<128x128xf32>
    %21 = math.log %14 : vector<128x128xf32>
    %22 = arith.select %20, %6, %21 : vector<128x128xi1>, vector<128x128xf32>
    %cst_11 = arith.constant 0.000000e+00 : f32
    %23 = vector.broadcast %cst_11 : f32 to vector<128x128xf32>
    %24 = arith.subf %23, %22 : vector<128x128xf32>
    %25 = arith.mulf %14, %14 : vector<128x128xf32>
    %26 = arith.mulf %5, %5 : vector<128x128xf32>
    %27 = arith.addf %25, %26 : vector<128x128xf32>
    %cst_12 = arith.constant 5.000000e-01 : f32
    %28 = vector.broadcast %cst_12 : f32 to vector<128x128xf32>
    %29 = arith.mulf %28, %27 : vector<128x128xf32>
    %30 = arith.addf %24, %29 : vector<128x128xf32>
    %cst_13 = arith.constant 5.000000e-01 : f32
    %31 = vector.broadcast %cst_13 : f32 to vector<128x128xf32>
    %32 = arith.subf %30, %31 : vector<128x128xf32>
    %c0_14 = arith.constant 0 : index
    %c0_15 = arith.constant 0 : index
    %33 = vector.load %arg11[%c0_14, %c0_15] : memref<8x128xf32, #tpu.memory_space<vmem>>, vector<8x128xf32>
    %34 = vector.shape_cast %32 : vector<128x128xf32> to vector<16x8x128xf32>
    %cst_16 = arith.constant dense<0.000000e+00> : vector<8x128xf32>
    %35 = vector.multi_reduction <add>, %34, %cst_16 [0] : vector<16x8x128xf32> to vector<8x128xf32>
    %36 = arith.addf %33, %35 : vector<8x128xf32>
    %c0_17 = arith.constant 0 : index
    %c0_18 = arith.constant 0 : index
    %37 = vector.load %arg11[%c0_17, %c0_18] : memref<8x128xf32, #tpu.memory_space<vmem>>, vector<8x128xf32>
    tpu.vector_store %arg11[%c0_17, %c0_18], %36 {strides = array<i32>} : memref<8x128xf32, #tpu.memory_space<vmem>>, vector<8x128xf32>,
    %c0_19 = arith.constant 0 : index
    %c0_20 = arith.constant 0 : index
    %38 = vector.load %arg5[%c0_19, %c0_20] : memref<1x128xf32, #tpu.memory_space<vmem>>, vector<1x128xf32>
    %c0_21 = arith.constant 0 : index
    %c0_22 = arith.constant 0 : index
    %39 = vector.load %arg6[%c0_21, %c0_22] : memref<1x128xf32, #tpu.memory_space<vmem>>, vector<1x128xf32>
    %cst_23 = arith.constant 0.000000e+00 : f32
    %40 = vector.broadcast %cst_23 : f32 to vector<1x128xf32>
    %41 = arith.maximumf %39, %40 : vector<1x128xf32>
    %42 = math.absf %39 : vector<1x128xf32>
    %cst_24 = arith.constant 0.000000e+00 : f32
    %43 = vector.broadcast %cst_24 : f32 to vector<1x128xf32>
    %44 = arith.subf %43, %42 : vector<1x128xf32>
    %45 = math.exp %44 : vector<1x128xf32>
    %46 = math.log1p %45 : vector<1x128xf32>
    %47 = arith.addf %41, %46 : vector<1x128xf32>
    %c0_25 = arith.constant 0 : index
    %c0_26 = arith.constant 0 : index
    %48 = vector.load %arg7[%c0_25, %c0_26] : memref<1x128xf32, #tpu.memory_space<vmem>>, vector<1x128xf32>
    %49 = arith.mulf %47, %48 : vector<1x128xf32>
    %50 = arith.addf %38, %49 : vector<1x128xf32>
    %c0_27 = arith.constant 0 : index
    %c0_28 = arith.constant 0 : index
    %51 = vector.load %arg9[%c0_27, %c0_28] : memref<1x128xf32, #tpu.memory_space<vmem>>, vector<1x128xf32>
    tpu.vector_store %arg9[%c0_27, %c0_28], %50 {strides = array<i32>} : memref<1x128xf32, #tpu.memory_space<vmem>>, vector<1x128xf32>,
    %c0_i32_29 = arith.constant 0 : i32
    %52 = arith.cmpi eq, %arg1, %c0_i32_29 : i32
    %53 = arith.extui %52 : i1 to i32
    %c0_i32_30 = arith.constant 0 : i32
    %54 = arith.cmpi ne, %53, %c0_i32_30 : i32
    scf.if %54 {
      %cst_34 = arith.constant -2.000000e+01 : f32
      %60 = vector.broadcast %cst_34 : f32 to vector<1x128xf32>
      %61 = arith.cmpf olt, %39, %60 : vector<1x128xf32>
      %62 = math.log %47 : vector<1x128xf32>
      %63 = arith.select %61, %39, %62 : vector<1x128xi1>, vector<1x128xf32>
      %cst_35 = arith.constant 0.000000e+00 : f32
      %64 = vector.broadcast %cst_35 : f32 to vector<1x128xf32>
      %65 = arith.subf %64, %63 : vector<1x128xf32>
      %66 = arith.mulf %47, %47 : vector<1x128xf32>
      %67 = arith.mulf %38, %38 : vector<1x128xf32>
      %68 = arith.addf %66, %67 : vector<1x128xf32>
      %cst_36 = arith.constant 5.000000e-01 : f32
      %69 = vector.broadcast %cst_36 : f32 to vector<1x128xf32>
      %70 = arith.mulf %69, %68 : vector<1x128xf32>
      %71 = arith.addf %65, %70 : vector<1x128xf32>
      %cst_37 = arith.constant 5.000000e-01 : f32
      %72 = vector.broadcast %cst_37 : f32 to vector<1x128xf32>
      %73 = arith.subf %71, %72 : vector<1x128xf32>
      %c0_38 = arith.constant 0 : index
      %c0_39 = arith.constant 0 : index
      %74 = vector.load %arg11[%c0_38, %c0_39] : memref<8x128xf32, #tpu.memory_space<vmem>>, vector<1x128xf32>
      %75 = arith.addf %74, %73 : vector<1x128xf32>
      %c0_40 = arith.constant 0 : index
      %c0_41 = arith.constant 0 : index
      %76 = vector.load %arg11[%c0_40, %c0_41] : memref<8x128xf32, #tpu.memory_space<vmem>>, vector<1x128xf32>
      tpu.vector_store %arg11[%c0_40, %c0_41], %75 {strides = array<i32>} : memref<8x128xf32, #tpu.memory_space<vmem>>, vector<1x128xf32>,
    } else {
    }
    %c0_i32_31 = arith.constant 0 : i32
    %55 = arith.cmpi eq, %arg0, %c0_i32_31 : i32
    %c0_i32_32 = arith.constant 0 : i32
    %56 = arith.cmpi eq, %arg1, %c0_i32_32 : i32
    %57 = arith.andi %55, %56 : i1
    %58 = arith.extui %57 : i1 to i32
    %c0_i32_33 = arith.constant 0 : i32
    %59 = arith.cmpi ne, %58, %c0_i32_33 : i32
    scf.if %59 {
      %c0_34 = arith.constant 0 : index
      %c0_35 = arith.constant 0 : index
      %60 = vector.load %arg11[%c0_34, %c0_35] : memref<8x128xf32, #tpu.memory_space<vmem>>, vector<8x128xf32>
      %61 = vector.shape_cast %60 : vector<8x128xf32> to vector<1x8x128xf32>
      %cst_36 = arith.constant dense<0.000000e+00> : vector<1xf32>
      %62 = vector.multi_reduction <add>, %61, %cst_36 [1, 2] : vector<1x8x128xf32> to vector<1xf32>
      %63 = vector.shape_cast %62 : vector<1xf32> to vector<1x1x1xf32>
      %64 = vector.extract %63[0, 0, 0] : f32 from vector<1x1x1xf32>
      %65 = vector.broadcast %64 : f32 to vector<1x1xf32>
      %c0_37 = arith.constant 0 : index
      %c0_38 = arith.constant 0 : index
      %66 = vector.load %arg10[%c0_37, %c0_38] : memref<1x1xf32, #tpu.memory_space<vmem>>, vector<1x1xf32>
      tpu.vector_store %arg10[%c0_37, %c0_38], %65 {strides = array<i32>} : memref<1x1xf32, #tpu.memory_space<vmem>>, vector<1x1xf32>,
    } else {
    }
    return
  }
  func.func @transform_0(%arg0: i32, %arg1: i32) -> (i32, i32) {
    %c0_i32 = arith.constant 0 : i32
    return %arg1, %arg0 : i32, i32
  }
  func.func @transform_1(%arg0: i32, %arg1: i32) -> (i32, i32) {
    %c0_i32 = arith.constant 0 : i32
    return %arg1, %arg0 : i32, i32
  }
  func.func @transform_2(%arg0: i32, %arg1: i32) -> (i32, i32) {
    %c0_i32 = arith.constant 0 : i32
    return %arg1, %arg0 : i32, i32
  }
  func.func @transform_3(%arg0: i32, %arg1: i32) -> (i32, i32) {
    %c0_i32 = arith.constant 0 : i32
    %c0_i32_0 = arith.constant 0 : i32
    return %c0_i32, %arg0 : i32, i32
  }
  func.func @transform_4(%arg0: i32, %arg1: i32) -> (i32, i32) {
    %c0_i32 = arith.constant 0 : i32
    %c0_i32_0 = arith.constant 0 : i32
    return %c0_i32, %arg0 : i32, i32
  }
  func.func @transform_5(%arg0: i32, %arg1: i32) -> (i32, i32) {
    %c0_i32 = arith.constant 0 : i32
    %c0_i32_0 = arith.constant 0 : i32
    return %c0_i32, %arg0 : i32, i32
  }
  func.func @transform_6(%arg0: i32, %arg1: i32) -> (i32, i32) {
    %c0_i32 = arith.constant 0 : i32
    return %arg1, %arg0 : i32, i32
  }
  func.func @transform_7(%arg0: i32, %arg1: i32) -> (i32, i32) {
    %c0_i32 = arith.constant 0 : i32
    %c0_i32_0 = arith.constant 0 : i32
    return %c0_i32, %arg0 : i32, i32
  }
  func.func @transform_8(%arg0: i32, %arg1: i32) -> (i32, i32) {
    %c0_i32 = arith.constant 0 : i32
    %c0_i32_0 = arith.constant 0 : i32
    %c0_i32_1 = arith.constant 0 : i32
    return %c0_i32, %c0_i32_0 : i32, i32
  }
}

</mosaic_0001>

<bundles_post_ra>
// kernel: tpu_custom_call.1
= control target key start
LH: loop header
LB: loop body
LE: loop exit
PB: predicated region body
PF: predicated region fallthrough
CT: control target
= control target key end

     0   :  { %14 = vsyncpa [#allocation4], 0  ;;  %s1794_s0 = inlined_call_operand.hbm [shape: f32[128,128], index: 0, kind: input, shape index: {}]   ;;  %s1795_s1 = inlined_call_operand.hbm [shape: f32[128,128], index: 1, kind: input, shape index: {}]   ;;  %s1796_s2 = inlined_call_operand.hbm [shape: f32[128,128], index: 2, kind: input, shape index: {}]   ;;  %s1797_s3 = inlined_call_operand.vmem [shape: f32[1,128], index: 3, kind: input, shape index: {}]   ;;  %s1798_s4 = inlined_call_operand.vmem [shape: f32[1,128], index: 4, kind: input, shape index: {}]   ;;  %s1799_s5 = inlined_call_operand.vmem [shape: f32[1,128], index: 5, kind: input, shape index: {}]   ;;  %s1800_s6 = inlined_call_operand.hbm [shape: f32[128,128], index: 6, kind: output, shape index: {0}]   ;;  %s1801_s7 = inlined_call_operand.hbm [shape: f32[1,128], index: 7, kind: output, shape index: {1}]   ;;  %s1802_s8 = inlined_call_operand.hbm [shape: f32[1,1], index: 8, kind: output, shape index: {2}]  }
   0x1   :  { %15 = vsyncpa [#allocation7], 0 }
   0x2   :  { %16 = vsyncpa [#allocation5], 0 }
   0x3   :  { %17 = vsyncpa [#allocation11], 0  ;;  %s35_s29 = sshll.u32 %s1795_s1, 4  ;;  %s998_s30 = smov [#allocation6]   ;;  %s36_s29 = int_to_ptr.hbm [resolvable:$true] %s35_s29 }
   0x4   :  { %s37_s9 = sshll.u32 %s998_s30, 4  ;;  %s22_s12 = sshll.u32 %s1794_s0, 4  ;;  %s38_s9 = int_to_ptr.vmem [resolvable:$true] %s37_s9  ;;  %s23_s12 = int_to_ptr.hbm [resolvable:$true] %s22_s12 }
   0x5   :  { %s999_s13 = smov 128   ;;  %s1000_s14 = smov 8  }
   0x6   :  { %43 = dma.hbm_to_vmem [thread:$0]  %s36_s29, 2048, %s38_s9, [#allocation7], %s999_s13, %s999_s13, %s1000_s14  }
   0x7   :  { %s1001_s15 = smov [#allocation3]   ;;  %s48_s1 = sshll.u32 %s1796_s2, 4  ;;  %s49_s1 = int_to_ptr.hbm [resolvable:$true] %s48_s1 }
   0x8   :  { %s24_s16 = sshll.u32 %s1001_s15, 4  ;;  %s1002_s0 = smov [#allocation8]   ;;  %s25_s16 = int_to_ptr.vmem [resolvable:$true] %s24_s16 }
   0x9   :  { %30 = dma.hbm_to_vmem [thread:$0]  %s23_s12, 2048, %s25_s16, [#allocation4], %s999_s13, %s999_s13, %s1000_s14  }
   0xa   :  { %s50_s19 = sshll.u32 %s1002_s0, 4  ;;  %s51_s19 = int_to_ptr.vmem [resolvable:$true] %s50_s19 }
   0xb   :  { %56 = dma.hbm_to_vmem [thread:$0]  %s49_s1, 2048, %s51_s19, [#allocation7], %s999_s13, %s999_s13, %s1000_s14  }
   0xc   :  { %990 = dma.done.wait [#allocation4], 2048  }
   0xd   :  { %991 = vsyncadd [#allocation4], 4294965248 }
   0xe   :  { %992 = dma.done.wait [#allocation7], 4096  }
   0xf   :  { %993 = vsyncadd [#allocation7], 4294963200  ;;  %v1069_v0 = vld [vmem:[#allocation6] sm:$0xff]  ;;  %v1071_v1 = vld [vmem:[#allocation6 + $0x8] sm:$0xff]  ;;  %s685_s26 = sshll.u32 %s1801_s7, 4  ;;  %s671_s29 = sshll.u32 %s1800_s6, 4  ;;  %s686_s26 = int_to_ptr.hbm [resolvable:$true] %s685_s26  ;;  %s672_s29 = int_to_ptr.hbm [resolvable:$true] %s671_s29 }
  0x10   :  { %v1073_v2 = vld [vmem:[#allocation6 + $0x10] sm:$0xff]  ;;  %v1075_v3 = vld [vmem:[#allocation6 + $0x18] sm:$0xff]  ;;  %v130_v4 = vand.u32 2147483647, %v1069_v0  ;;  %v1078_v5 = vld [vmem:[#allocation6 + $0x20] sm:$0xff]  ;;  %s1004_s30 = smov [#allocation9]  }
  0x11   :  { %v131_v6 = vand.u32 2147483647, %v1071_v1  ;;  %v1081_v7 = vld [vmem:[#allocation6 + $0x28] sm:$0xff]  ;;  %v132_v8 = vand.u32 2147483647, %v1073_v2  ;;  %v1084_v9 = vld [vmem:[#allocation6 + $0x30] sm:$0xff] }
  0x12   :  { %v133_v10 = vand.u32 2147483647, %v1075_v3  ;;  %v1087_v11 = vld [vmem:[#allocation6 + $0x38] sm:$0xff]  ;;  %v134_v12 = vand.u32 2147483647, %v1078_v5  ;;  %v146_v13 = vsub.f32 0.0, %v130_v4 }
  0x13   :  { %v1090_v14 = vld [vmem:[#allocation6 + $0x40] sm:$0xff]  ;;  %v135_v15 = vand.u32 2147483647, %v1081_v7  ;;  %v147_v16 = vsub.f32 0.0, %v131_v6  ;;  %v1093_v17 = vld [vmem:[#allocation6 + $0x48] sm:$0xff]  ;;  %v148_v21 = vsub.f32 0.0, %v132_v8 }
  0x14   :  { %1819 = vst [vmem:[#allocation17_spill] sm:$0xff] %v1093_v17  ;;  %v136_v20 = vand.u32 2147483647, %v1084_v9  ;;  %v1098_v22 = vld [vmem:[#allocation6 + $0x50] sm:$0xff]  ;;  %v137_v25 = vand.u32 2147483647, %v1087_v11 }
  0x15   :  { %1820 = vst [vmem:[#allocation18_spill] sm:$0xff] %v1098_v22  ;;  %v149_v26 = vsub.f32 0.0, %v133_v10  ;;  %v1103_v27 = vld [vmem:[#allocation6 + $0x58] sm:$0xff]  ;;  %v138_v28 = vand.u32 2147483647, %v1090_v14  ;;  %v150_v29 = vsub.f32 0.0, %v134_v12 }
  0x16   :  { %1821 = vst [vmem:[#allocation19_spill] sm:$0xff] %v1103_v27  ;;  %v162_v30 = vmul.f32 1.442695, %v146_v13  ;;  %v1106_v31 = vld [vmem:[#allocation6 + $0x60] sm:$0xff]  ;;  %v139_v32 = vand.u32 2147483647, %v1093_v17 }
  0x17   :  { %1822 = vst [vmem:[#allocation20_spill] sm:$0xff] %v1106_v31  ;;  %v151_v33 = vsub.f32 0.0, %v135_v15  ;;  %v164_v34 = vmul.f32 1.442695, %v147_v16  ;;  %v1109_v35 = vld [vmem:[#allocation6 + $0x68] sm:$0xff]  ;;  %v152_v37 = vsub.f32 0.0, %v136_v20 }
  0x18   :  { %1823 = vst [vmem:[#allocation21_spill] sm:$0xff] %v1109_v35  ;;  %v140_v36 = vand.u32 2147483647, %v1098_v22  ;;  %v166_v38 = vmul.f32 1.442695, %v148_v21  ;;  %v1112_v39 = vld [vmem:[#allocation6 + $0x70] sm:$0xff]  ;;  %744 = vpow2.f32 %v162_v30 }
  0x19   :  { %1824 = vst [vmem:[#allocation22_spill] sm:$0xff] %v1112_v39  ;;  %v141_v40 = vand.u32 2147483647, %v1103_v27  ;;  %v153_v41 = vsub.f32 0.0, %v137_v25  ;;  %v168_v42 = vmul.f32 1.442695, %v149_v26  ;;  %746 = vpow2.f32 %v164_v34 }
  0x1a   :  { %v1115_v43 = vld [vmem:[#allocation6 + $0x78] sm:$0xff]  ;;  %v142_v44 = vand.u32 2147483647, %v1106_v31  ;;  %v154_v45 = vsub.f32 0.0, %v138_v28  ;;  %v170_v46 = vmul.f32 1.442695, %v150_v29  ;;  %748 = vpow2.f32 %v166_v38 }
  0x1b   :  { %1825 = vst [vmem:[#allocation23_spill] sm:$0xff] %v1115_v43  ;;  %v143_v47 = vand.u32 2147483647, %v1109_v35  ;;  %v155_v48 = vsub.f32 0.0, %v139_v32  ;;  %v172_v49 = vmul.f32 1.442695, %v151_v33  ;;  %750 = vpow2.f32 %v168_v42 }
  0x1c   :  { %v144_v50 = vand.u32 2147483647, %v1112_v39  ;;  %v156_v51 = vsub.f32 0.0, %v140_v36  ;;  %v174_v52 = vmul.f32 1.442695, %v152_v37  ;;  %v157_v54 = vsub.f32 0.0, %v141_v40 }
  0x1d   :  { %v145_v53 = vand.u32 2147483647, %v1115_v43  ;;  %v176_v55 = vmul.f32 1.442695, %v153_v41  ;;  %v158_v57 = vsub.f32 0.0, %v142_v44  ;;  %752 = vpow2.f32 %v170_v46  ;;  %s669_s9 = sshll.u32 %s1004_s30, 4  ;;  %s670_s9 = int_to_ptr.vmem [resolvable:$true] %s669_s9 }
  0x1e   :  { %v178_v58 = vmul.f32 1.442695, %v154_v45  ;;  %v159_v60 = vsub.f32 0.0, %v143_v47  ;;  %754 = vpow2.f32 %v172_v49  ;;  %v180_v61 = vmul.f32 1.442695, %v155_v48  ;;  %v1123_v62 = vpop.eup %744  ;;  %s1005_s7 = smov [#allocation12]  }
  0x1f   :  { %v160_v4 = vsub.f32 0.0, %v144_v50  ;;  %756 = vpow2.f32 %v174_v52  ;;  %v182_v6 = vmul.f32 1.442695, %v156_v51  ;;  %v1126_v8 = vpop.eup %746  ;;  %v161_v12 = vsub.f32 0.0, %v145_v53  ;;  %s694_s10 = sshll.u32 %s1005_s7, 4  ;;  %s696_s12 = sshll.u32 %s1802_s8, 4  ;;  %s695_s10 = int_to_ptr.vmem [resolvable:$true] %s694_s10  ;;  %s697_s12 = int_to_ptr.hbm [resolvable:$true] %s696_s12 }
  0x20   :  { %758 = vpow2.f32 %v176_v55  ;;  %v184_v13 = vmul.f32 1.442695, %v157_v54  ;;  %v1129_v15 = vpop.eup %748  ;;  %v186_v20 = vmul.f32 1.442695, %v158_v57  ;;  %v197_v21 = vmul.f32 -0.5, %v1123_v62 }
  0x21   :  { %760 = vpow2.f32 %v178_v58  ;;  %v1133_v25 = vpop.eup %750  ;;  %v188_v29 = vmul.f32 1.442695, %v159_v60  ;;  %v190_v33 = vmul.f32 1.442695, %v160_v4  ;;  %v206_v34 = vmul.f32 -0.5, %v1126_v8 }
  0x22   :  { %762 = vpow2.f32 %v180_v61  ;;  %v192_v40 = vmul.f32 1.442695, %v161_v12  ;;  %v194_v44 = vadd.f32 1.0, %v1123_v62  ;;  %v198_v45 = vadd.f32 1.0, %v197_v21 }
  0x23   :  { %v1137_v30 = vpop.eup %752  ;;  %764 = vpow2.f32 %v182_v6  ;;  %v200_v48 = vand.u32 2147483647, %v1123_v62  ;;  %v203_v49 = vadd.f32 1.0, %v1126_v8  ;;  %v207_v51 = vadd.f32 1.0, %v206_v34 }
  0x24   :  { %v1141_v36 = vpop.eup %754  ;;  %766 = vpow2.f32 %v184_v13  ;;  %v212_v52 = vadd.f32 1.0, %v1129_v15  ;;  %v215_v53 = vmul.f32 -0.5, %v1129_v15  ;;  %v209_v55 = vand.u32 2147483647, %v1126_v8 }
  0x25   :  { %v1145_v41 = vpop.eup %756  ;;  %768 = vpow2.f32 %v186_v20  ;;  %v221_v57 = vadd.f32 1.0, %v1133_v25  ;;  %v224_v58 = vmul.f32 -0.5, %v1133_v25  ;;  %v1166_v61 = vmul.f32 %v1123_v62, %v198_v45 }
  0x26   :  { %v1149_v46 = vpop.eup %758  ;;  %770 = vpow2.f32 %v188_v29  ;;  %v230_v4 = vadd.f32 1.0, %v1137_v30  ;;  %v233_v6 = vmul.f32 -0.5, %v1137_v30  ;;  %v218_v13 = vand.u32 2147483647, %v1129_v15 }
  0x27   :  { %v1154_v50 = vpop.eup %760  ;;  %772 = vpow2.f32 %v190_v33  ;;  %v239_v20 = vadd.f32 1.0, %v1141_v36  ;;  %v242_v21 = vmul.f32 -0.5, %v1141_v36  ;;  %v1178_v33 = vmul.f32 %v1126_v8, %v207_v51 }
  0x28   :  { %v1158_v54 = vpop.eup %762  ;;  %774 = vpow2.f32 %v192_v40  ;;  %v216_v62 = vadd.f32 1.0, %v215_v53  ;;  %v248_v34 = vadd.f32 1.0, %v1145_v41  ;;  %v227_v45 = vand.u32 2147483647, %v1133_v25 }
  0x29   :  { %v1163_v60 = vpop.eup %764  ;;  %776 = vlog2.f32 %v194_v44  ;;  %v225_v44 = vadd.f32 1.0, %v224_v58  ;;  %vm1187_vm0 = vcmp.lt.f32.partialorder %v200_v48, 0.0004427343  ;;  %v234_v8 = vadd.f32 1.0, %v233_v6 }
  0x2a   :  { %v1170_v12 = vpop.eup %766  ;;  %778 = vlog2.f32 %v203_v49  ;;  %v236_v49 = vand.u32 2147483647, %v1137_v30  ;;  %v245_v51 = vand.u32 2147483647, %v1141_v36  ;;  %vm1195_vm1 = vcmp.lt.f32.partialorder %v209_v55, 0.0004427343 }
  0x2b   :  { %v1175_v29 = vpop.eup %768  ;;  %780 = vlog2.f32 %v212_v52  ;;  %v251_v52 = vmul.f32 -0.5, %v1145_v41  ;;  %v243_v58 = vadd.f32 1.0, %v242_v21  ;;  %v254_v38 = vand.u32 2147483647, %v1145_v41 }
  0x2c   :  { %v1181_v40 = vpop.eup %770  ;;  %782 = vlog2.f32 %v221_v57  ;;  %v260_v48 = vmul.f32 -0.5, %v1149_v46  ;;  %vm1204_vm2 = vcmp.lt.f32.partialorder %v218_v13, 0.0004427343  ;;  %v257_v55 = vadd.f32 1.0, %v1149_v46 }
  0x2d   :  { %v1185_v47 = vpop.eup %772  ;;  %784 = vlog2.f32 %v230_v4  ;;  %v1202_v4 = vmul.f32 %v1129_v15, %v216_v62  ;;  %v1210_v28 = vmul.f32 %v1133_v25, %v225_v44  ;;  %vm1212_vm3 = vcmp.lt.f32.partialorder %v227_v45, 0.0004427343 }
  0x2e   :  { %v1193_v53 = vpop.eup %774  ;;  %786 = vlog2.f32 %v239_v20  ;;  %vm1216_vm4 = vcmp.lt.f32.partialorder %v236_v49, 0.0004427343  ;;  %v266_v15 = vadd.f32 1.0, %v1154_v50  ;;  %v1222_v62 = vmul.f32 %v1137_v30, %v234_v8  ;;  %v362_v49 = vld [vmem:[#allocation8 + $0x40] sm:$0xff] }
  0x2f   :  { %v777_v37 = vpop.eup %776  ;;  %788 = vlog2.f32 %v248_v34  ;;  %vm1224_vm5 = vcmp.lt.f32.partialorder %v245_v51, 0.0004427343  ;;  %v252_v25 = vadd.f32 1.0, %v251_v52  ;;  %v269_v44 = vmul.f32 -0.5, %v1154_v50 }
  0x30   :  { %v779_v32 = vpop.eup %778  ;;  %v1230_v26 = vmul.f32 %v1141_v36, %v243_v58  ;;  %vm1232_vm6 = vcmp.lt.f32.partialorder %v254_v38, 0.0004427343  ;;  %v261_v16 = vadd.f32 1.0, %v260_v48  ;;  %v275_v10 = vadd.f32 1.0, %v1158_v54 }
  0x31   :  { %v781_v13 = vpop.eup %780  ;;  %v1237_v8 = vmul.f32 0.6931472, %v777_v37  ;;  %790 = vlog2.f32 %v257_v55  ;;  %v263_v51 = vand.u32 2147483647, %v1149_v46  ;;  %v284_v52 = vadd.f32 1.0, %v1163_v60 }
  0x32   :  { %v783_v45 = vpop.eup %782  ;;  %v1241_v59 = vmul.f32 0.6931472, %v779_v32  ;;  %792 = vlog2.f32 %v266_v15  ;;  %v272_v36 = vand.u32 2147483647, %v1154_v50  ;;  %v278_v38 = vmul.f32 -0.5, %v1158_v54 }
  0x33   :  { %v785_v30 = vpop.eup %784  ;;  %v1245_v48 = vmul.f32 0.6931472, %v781_v13  ;;  %v1247_v56 = vmul.f32 0.6931472, %v783_v45  ;;  %v1250_v37 = vmul.f32 %v1145_v41, %v252_v25  ;;  %v270_v55 = vadd.f32 1.0, %v269_v44 }
  0x34   :  { %v787_v63 = vpop.eup %786  ;;  %v1252_v24 = vmul.f32 0.6931472, %v785_v30  ;;  %v1255_v23 = vmul.f32 %v1149_v46, %v261_v16  ;;  %794 = vlog2.f32 %v275_v10  ;;  %v287_v32 = vmul.f32 -0.5, %v1163_v60 }
  0x35   :  { %v789_v58 = vpop.eup %788  ;;  %v1258_v15 = vmul.f32 0.6931472, %v787_v63  ;;  %vm1260_vm7 = vcmp.lt.f32.partialorder %v263_v51, 0.0004427343  ;;  %v281_v13 = vand.u32 2147483647, %v1158_v54  ;;  %796 = vlog2.f32 %v284_v52 }
  0x36   :  { %v293_v41 = vadd.f32 1.0, %v1170_v12  ;;  %v1270_v46 = vmul.f32 0.6931472, %v789_v58  ;;  %vm1272_vm8 = vcmp.lt.f32.partialorder %v272_v36, 0.0004427343  ;;  %v279_v63 = vadd.f32 1.0, %v278_v38 }
  0x37   :  { %v791_v25 = vpop.eup %790  ;;  %v1289_v51 = vmul.f32 %v1154_v50, %v270_v55  ;;  %v288_v38 = vadd.f32 1.0, %v287_v32  ;;  %v302_v58 = vadd.f32 1.0, %v1175_v29  ;;  %vm1300_vm9 = vcmp.lt.f32.partialorder %v281_v13, 0.0004427343 }
  0x38   :  { %v793_v52 = vpop.eup %792  ;;  %798 = vlog2.f32 %v293_v41  ;;  %v290_v50 = vand.u32 2147483647, %v1163_v60  ;;  %v296_v55 = vmul.f32 -0.5, %v1170_v12  ;;  %v1310_v41 = vmul.f32 0.6931472, %v791_v25 }
  0x39   :  { %v1313_v36 = vmul.f32 %v1158_v54, %v279_v63  ;;  %v311_v13 = vadd.f32 1.0, %v1181_v40  ;;  %v1316_v16 = vmul.f32 0.6931472, %v793_v52  ;;  %v305_v18 = vmul.f32 -0.5, %v1175_v29 }
  0x3a   :  { %v795_v44 = vpop.eup %794  ;;  %v314_v43 = vmul.f32 -0.5, %v1181_v40  ;;  %v320_v39 = vadd.f32 1.0, %v1185_v47  ;;  %v1322_v35 = vmul.f32 %v1163_v60, %v288_v38  ;;  %v299_v25 = vand.u32 2147483647, %v1170_v12 }
  0x3b   :  { %v797_v45 = vpop.eup %796  ;;  %800 = vlog2.f32 %v302_v58  ;;  %v329_v54 = vadd.f32 1.0, %v1193_v53  ;;  %v1326_v63 = vmul.f32 0.6931472, %v795_v44  ;;  %vm1328_vm10 = vcmp.lt.f32.partialorder %v290_v50, 0.0004427343 }
  0x3c   :  { %v297_v52 = vadd.f32 1.0, %v296_v55  ;;  %v323_v31 = vmul.f32 -0.5, %v1185_v47  ;;  %v1333_v22 = vmul.f32 0.6931472, %v797_v45  ;;  %v308_v60 = vand.u32 2147483647, %v1175_v29 }
  0x3d   :  { %802 = vlog2.f32 %v311_v13  ;;  %v317_v38 = vand.u32 2147483647, %v1181_v40  ;;  %v306_v58 = vadd.f32 1.0, %v305_v18  ;;  %v315_v17 = vadd.f32 1.0, %v314_v43 }
  0x3e   :  { %v799_v27 = vpop.eup %798  ;;  %804 = vlog2.f32 %v320_v39  ;;  %v326_v44 = vand.u32 2147483647, %v1185_v47  ;;  %v265_v50 = vsel %vm1260_vm7, %v1255_v23, %v1310_v41  ;;  %v274_v45 = vsel %vm1272_vm8, %v1289_v51, %v1316_v16  ;;  %v365_v16 = vld [vmem:[#allocation8 + $0x58] sm:$0xff]  ;;  %v367_v51 = vld [vmem:[#allocation8 + $0x68] sm:$0xff] }
  0x3f   :  { %806 = vlog2.f32 %v329_v54  ;;  %v332_v55 = vmul.f32 -0.5, %v1193_v53  ;;  %v1347_v13 = vmul.f32 0.6931472, %v799_v27  ;;  %v1350_v18 = vmul.f32 %v1170_v12, %v297_v52 }
  0x40   :  { %vm1352_vm11 = vcmp.lt.f32.partialorder %v299_v25, 0.0004427343  ;;  %v324_v43 = vadd.f32 1.0, %v323_v31  ;;  %v283_v23 = vsel %vm1300_vm9, %v1313_v36, %v1326_v63  ;;  %v292_v27 = vsel %vm1328_vm10, %v1322_v35, %v1333_v22  ;;  %v354_v31 = vld [vmem:[#allocation8] sm:$0xff]  ;;  %v355_v35 = vld [vmem:[#allocation8 + $0x8] sm:$0xff]  ;;  %v356_v36 = vld [vmem:[#allocation8 + $0x10] sm:$0xff] }
  0x41   :  { %v801_v19 = vpop.eup %800  ;;  %vm1364_vm12 = vcmp.lt.f32.partialorder %v308_v60, 0.0004427343  ;;  %vm1368_vm13 = vcmp.lt.f32.partialorder %v317_v38, 0.0004427343  ;;  %v1373_v10 = vmul.f32 %v1175_v29, %v306_v58  ;;  %v1376_v30 = vmul.f32 %v1181_v40, %v315_v17 }
  0x42   :  { %vm1378_vm14 = vcmp.lt.f32.partialorder %v326_v44, 0.0004427343  ;;  %v335_v22 = vand.u32 2147483647, %v1193_v53  ;;  %v333_v41 = vadd.f32 1.0, %v332_v55  ;;  %v1856_v25 = vmax.f32 %v1069_v0, 0.0 }
  0x43   :  { %v803_v32 = vpop.eup %802  ;;  %v1857_v29 = vsel %vm1187_vm0, %v1166_v61, %v1237_v8  ;;  %v1858_v17 = vmax.f32 %v1071_v1, 0.0  ;;  %v1859_v40 = vsel %vm1195_vm1, %v1178_v33, %v1241_v59  ;;  %v1860_v52 = vmax.f32 %v1073_v2, 0.0  ;;  %v357_v61 = vld [vmem:[#allocation8 + $0x18] sm:$0xff] }
  0x44   :  { %v1390_v54 = vadd.f32 %v1857_v29, %v1856_v25  ;;  %v1861_v42 = vsel %vm1204_vm2, %v1202_v4, %v1245_v48  ;;  %v805_v8 = vpop.eup %804  ;;  %v301_v57 = vsel %vm1352_vm11, %v1350_v18, %v1347_v13  ;;  %v304_v38 = vmul.f32 0.6931472, %v801_v19  ;;  %v358_v48 = vld [vmem:[#allocation8 + $0x20] sm:$0xff]  ;;  %v359_v13 = vld [vmem:[#allocation8 + $0x28] sm:$0xff]  ;;  %v361_v25 = vld [vmem:[#allocation8 + $0x38] sm:$0xff] }
  0x45   :  { %v1399_v63 = vadd.f32 %v1859_v40, %v1858_v17  ;;  %v1408_v60 = vadd.f32 %v1861_v42, %v1860_v52  ;;  %v1415_v59 = vmul.f32 %v1185_v47, %v324_v43  ;;  %v1862_v33 = vmax.f32 %v1075_v3, 0.0  ;;  %v807_v58 = vpop.eup %806  ;;  %v1471_v17 = vld [vmem:[#allocation3 + $0x10] sm:$0xff]  ;;  %v363_v42 = vld [vmem:[#allocation8 + $0x48] sm:$0xff] }
  0x46   :  { %v1863_v4 = vsel %vm1212_vm3, %v1210_v28, %v1247_v56  ;;  %v1864_v44 = vmax.f32 %v1078_v5, 0.0  ;;  %v1865_v55 = vsel %vm1216_vm4, %v1222_v62, %v1252_v24  ;;  %v370_v18 = vmul.f32 %v354_v31, %v1390_v54  ;;  %v360_v62 = vld [vmem:[#allocation8 + $0x30] sm:$0xff]  ;;  %v1452_v31 = vld [vmem:[#allocation3] sm:$0xff] }
  0x47   :  { %v1424_v6 = vadd.f32 %v1863_v4, %v1862_v33  ;;  %v371_v20 = vmul.f32 %v355_v35, %v1399_v63  ;;  %v372_v56 = vmul.f32 %v356_v36, %v1408_v60  ;;  %v313_v28 = vmul.f32 0.6931472, %v803_v32  ;;  %v1454_v35 = vld [vmem:[#allocation3 + $0x8] sm:$0xff] }
  0x48   :  { %v1433_v47 = vadd.f32 %v1865_v55, %v1864_v44  ;;  %vm1438_vm15 = vcmp.lt.f32.partialorder %v335_v22, 0.0004427343  ;;  %v1868_v43 = vmax.f32 %v1081_v7, 0.0  ;;  %v1869_v24 = vsel %vm1224_vm5, %v1230_v26, %v1258_v15  ;;  %v364_v55 = vld [vmem:[#allocation8 + $0x50] sm:$0xff] }
  0x49   :  { %v373_v19 = vmul.f32 %v357_v61, %v1424_v6  ;;  %v334_v22 = vmul.f32 %v1193_v53, %v333_v41  ;;  %v1870_v36 = vmax.f32 %v1084_v9, 0.0  ;;  %v1871_v34 = vsel %vm1232_vm6, %v1250_v37, %v1270_v46  ;;  %v1478_v46 = vld [vmem:[#allocation3 + $0x18] sm:$0xff] }
  0x4a   :  { %v1449_v21 = vadd.f32 %v1869_v24, %v1868_v43  ;;  %v1872_v26 = vmax.f32 %v1087_v11, 0.0  ;;  %v374_v29 = vmul.f32 %v358_v48, %v1433_v47  ;;  %v322_v40 = vmul.f32 0.6931472, %v805_v8  ;;  %v1484_v8 = vld [vmem:[#allocation3 + $0x20] sm:$0xff] }
  0x4b   :  { %v1464_v32 = vadd.f32 %v1871_v34, %v1870_v36  ;;  %v331_v53 = vmul.f32 0.6931472, %v807_v58  ;;  %v1873_v41 = vmax.f32 %v1090_v14, 0.0  ;;  %v386_v61 = vadd.f32 %v370_v18, %v1452_v31  ;;  %v1874_v48 = vld [vmem:[#allocation17_spill] sm:$0xff]  ;;  %v1878_v36 = vld [vmem:[#allocation19_spill] sm:$0xff] }
  0x4c   :  { %v1468_v15 = vadd.f32 %v265_v50, %v1872_v26  ;;  %v375_v37 = vmul.f32 %v359_v13, %v1449_v21  ;;  %v387_v33 = vadd.f32 %v371_v20, %v1454_v35  ;;  %v388_v4 = vadd.f32 %v372_v56, %v1471_v17  ;;  %v1495_v18 = vld [vmem:[#allocation3 + $0x28] sm:$0xff]  ;;  %v1517_v26 = vld [vmem:[#allocation3 + $0x38] sm:$0xff] }
  0x4d   :  { %v1475_v52 = vadd.f32 %v274_v45, %v1873_v41  ;;  %v376_v50 = vmul.f32 %v360_v62, %v1464_v32  ;;  %v310_v45 = vsel %vm1364_vm12, %v1373_v10, %v304_v38  ;;  %v1875_v58 = vmax.f32 %v1874_v48, 0.0  ;;  %v1876_v56 = vld [vmem:[#allocation18_spill] sm:$0xff]  ;;  %402 = vst [vmem:[#allocation9] sm:$0xff] %v386_v61 }
  0x4e   :  { %v377_v13 = vmul.f32 %v361_v25, %v1468_v15  ;;  %v389_v43 = vadd.f32 %v373_v19, %v1478_v46  ;;  %v319_v20 = vsel %vm1368_vm13, %v1376_v30, %v313_v28  ;;  %v1877_v24 = vmax.f32 %v1876_v56, 0.0  ;;  %v1506_v38 = vld [vmem:[#allocation3 + $0x30] sm:$0xff]  ;;  %v366_v30 = vld [vmem:[#allocation8 + $0x60] sm:$0xff]  ;;  %403 = vst [vmem:[#allocation9 + $0x8] sm:$0xff] %v387_v33 }
  0x4f   :  { %v1491_v44 = vadd.f32 %v283_v23, %v1875_v58  ;;  %v378_v10 = vmul.f32 %v362_v49, %v1475_v52  ;;  %v390_v23 = vadd.f32 %v374_v29, %v1484_v8  ;;  %v328_v19 = vsel %vm1378_vm14, %v1415_v59, %v322_v40  ;;  %v1880_v29 = vld [vmem:[#allocation20_spill] sm:$0xff]  ;;  %404 = vst [vmem:[#allocation9 + $0x10] sm:$0xff] %v388_v4  ;;  %v368_v33 = vld [vmem:[#allocation8 + $0x70] sm:$0xff] }
  0x50   :  { %v1502_v62 = vadd.f32 %v292_v27, %v1877_v24  ;;  %v1879_v34 = vmax.f32 %v1878_v36, 0.0  ;;  %v391_v28 = vadd.f32 %v375_v37, %v1495_v18  ;;  %v337_v25 = vsel %vm1438_vm15, %v334_v22, %v331_v53  ;;  %v1527_v40 = vld [vmem:[#allocation3 + $0x40] sm:$0xff]  ;;  %405 = vst [vmem:[#allocation9 + $0x18] sm:$0xff] %v389_v43  ;;  %v1535_v53 = vld [vmem:[#allocation3 + $0x48] sm:$0xff] }
  0x51   :  { %v379_v27 = vmul.f32 %v363_v42, %v1491_v44  ;;  %v1881_v41 = vmax.f32 %v1880_v29, 0.0  ;;  %v1882_v42 = vld [vmem:[#allocation21_spill] sm:$0xff]  ;;  %v393_v22 = vadd.f32 %v377_v13, %v1517_v26  ;;  %v394_v24 = vadd.f32 %v378_v10, %v1527_v40  ;;  %406 = vst [vmem:[#allocation9 + $0x20] sm:$0xff] %v390_v23 }
  0x52   :  { %v1513_v12 = vadd.f32 %v301_v57, %v1879_v34  ;;  %v380_v59 = vmul.f32 %v364_v55, %v1502_v62  ;;  %v392_v57 = vadd.f32 %v376_v50, %v1506_v38  ;;  %v1883_v37 = vmax.f32 %v1882_v42, 0.0  ;;  %v369_v50 = vld [vmem:[#allocation8 + $0x78] sm:$0xff]  ;;  %407 = vst [vmem:[#allocation9 + $0x28] sm:$0xff] %v391_v28  ;;  %v1555_v10 = vld [vmem:[#allocation3 + $0x60] sm:$0xff] }
  0x53   :  { %v1523_v49 = vadd.f32 %v310_v45, %v1881_v41  ;;  %v1884_v45 = vld [vmem:[#allocation22_spill] sm:$0xff]  ;;  %v1886_v34 = vld [vmem:[#allocation23_spill] sm:$0xff]  ;;  %v395_v43 = vadd.f32 %v379_v27, %v1535_v53  ;;  %409 = vst [vmem:[#allocation9 + $0x38] sm:$0xff] %v393_v22  ;;  %808 = vlog2.f32 %v1390_v54  ;;  %vm418_vm0 = vcmp.lt.f32.partialorder %v1069_v0, -20.0 }
  0x54   :  { %v1531_v61 = vadd.f32 %v319_v20, %v1883_v37  ;;  %v381_v39 = vmul.f32 %v365_v16, %v1513_v12  ;;  %v1885_v58 = vmax.f32 %v1884_v45, 0.0  ;;  %v1543_v20 = vld [vmem:[#allocation3 + $0x50] sm:$0xff]  ;;  %v1887_v41 = vmax.f32 %v1886_v34, 0.0  ;;  %v1551_v37 = vld [vmem:[#allocation3 + $0x58] sm:$0xff]  ;;  %408 = vst [vmem:[#allocation9 + $0x30] sm:$0xff] %v392_v57 }
  0x55   :  { %v382_v4 = vmul.f32 %v366_v30, %v1523_v49  ;;  %v396_v30 = vadd.f32 %v380_v59, %v1543_v20  ;;  %410 = vst [vmem:[#allocation9 + $0x40] sm:$0xff] %v394_v24  ;;  %v1562_v27 = vld [vmem:[#allocation3 + $0x70] sm:$0xff]  ;;  %810 = vlog2.f32 %v1399_v63  ;;  %vm419_vm1 = vcmp.lt.f32.partialorder %v1071_v1, -20.0 }
  0x56   :  { %v1539_v55 = vadd.f32 %v328_v19, %v1885_v58  ;;  %v1547_v16 = vadd.f32 %v337_v25, %v1887_v41  ;;  %v383_v13 = vmul.f32 %v367_v51, %v1531_v61  ;;  %v397_v58 = vadd.f32 %v381_v39, %v1551_v37  ;;  %v1559_v25 = vld [vmem:[#allocation3 + $0x68] sm:$0xff]  ;;  %1888 = vst [vmem:[#allocation17_spill] sm:$0xff] %v1562_v27 }
  0x57   :  { %v398_v51 = vadd.f32 %v382_v4, %v1555_v10  ;;  %411 = vst [vmem:[#allocation9 + $0x48] sm:$0xff] %v395_v43  ;;  %812 = vlog2.f32 %v1408_v60  ;;  %vm420_vm2 = vcmp.lt.f32.partialorder %v1073_v2, -20.0  ;;  %v498_v39 = vmul.f32 %v1390_v54, %v1390_v54 }
  0x58   :  { %v384_v19 = vmul.f32 %v368_v33, %v1539_v55  ;;  %v385_v23 = vmul.f32 %v369_v50, %v1547_v16  ;;  %v399_v28 = vadd.f32 %v383_v13, %v1559_v25  ;;  %v1565_v33 = vld [vmem:[#allocation3 + $0x78] sm:$0xff]  ;;  %412 = vst [vmem:[#allocation9 + $0x50] sm:$0xff] %v396_v30  ;;  %814 = vlog2.f32 %v1424_v6 }
  0x59   :  { %1889 = vst [vmem:[#allocation18_spill] sm:$0xff] %v1565_v33  ;;  %816 = vlog2.f32 %v1433_v47  ;;  %v809_v22 = vpop.eup %808  ;;  %vm421_vm3 = vcmp.lt.f32.partialorder %v1075_v3, -20.0  ;;  %vm422_vm4 = vcmp.lt.f32.partialorder %v1078_v5, -20.0  ;;  %v499_v50 = vmul.f32 %v1399_v63, %v1399_v63 }
  0x5a   :  { %v400_v59 = vadd.f32 %v384_v19, %v1562_v27  ;;  %v401_v57 = vadd.f32 %v385_v23, %v1565_v33  ;;  %413 = vst [vmem:[#allocation9 + $0x58] sm:$0xff] %v397_v58  ;;  %818 = vlog2.f32 %v1449_v21  ;;  %v500_v4 = vmul.f32 %v1408_v60, %v1408_v60 }
  0x5b   :  { %414 = vst [vmem:[#allocation9 + $0x60] sm:$0xff] %v398_v51  ;;  %820 = vlog2.f32 %v1464_v32  ;;  %v1589_v24 = vmul.f32 %v1424_v6, %v1424_v6  ;;  %v811_v41 = vpop.eup %810  ;;  %vm423_vm5 = vcmp.lt.f32.partialorder %v1081_v7, -20.0  ;;  %v1594_v54 = vmul.f32 %v1433_v47, %v1433_v47 }
  0x5c   :  { %415 = vst [vmem:[#allocation9 + $0x68] sm:$0xff] %v399_v28  ;;  %v1598_v13 = vmul.f32 %v1449_v21, %v1449_v21  ;;  %v1602_v63 = vmul.f32 %v1464_v32, %v1464_v32  ;;  %v1606_v60 = vmul.f32 %v1468_v15, %v1468_v15  ;;  %vm424_vm6 = vcmp.lt.f32.partialorder %v1084_v9, -20.0 }
  0x5d   :  { %416 = vst [vmem:[#allocation9 + $0x70] sm:$0xff] %v400_v59  ;;  %v813_v6 = vpop.eup %812  ;;  %822 = vlog2.f32 %v1468_v15  ;;  %v1612_v47 = vmul.f32 %v1475_v52, %v1475_v52  ;;  %v1616_v21 = vmul.f32 %v1491_v44, %v1491_v44  ;;  %v1620_v32 = vmul.f32 %v1502_v62, %v1502_v62 }
  0x5e   :  { %417 = vst [vmem:[#allocation9 + $0x78] sm:$0xff] %v401_v57  ;;  %v815_v43 = vpop.eup %814  ;;  %v435_v19 = vmul.f32 0.6931472, %v809_v22  ;;  %824 = vlog2.f32 %v1475_v52  ;;  %v1625_v30 = vmul.f32 %v1513_v12, %v1513_v12  ;;  %v1629_v15 = vmul.f32 %v1523_v49, %v1523_v49 }
  0x5f   :  { %v817_v23 = vpop.eup %816  ;;  %vm425_vm7 = vcmp.lt.f32.partialorder %v1087_v11, -20.0  ;;  %v437_v58 = vmul.f32 0.6931472, %v811_v41  ;;  %v1634_v51 = vmul.f32 %v1531_v61, %v1531_v61  ;;  %v1638_v28 = vmul.f32 %v1539_v55, %v1539_v55  ;;  %677 = dma.vmem_to_hbm [thread:$0]  %s670_s9, 2048, %s672_s29, [#allocation5], %s999_s13, %s999_s13, %s1000_s14  }
  0x60   :  { %1890 = vst [vmem:[#allocation19_spill] sm:$0xff] %v1629_v15  ;;  %v1642_v52 = vmul.f32 %v1547_v16, %v1547_v16  ;;  %v819_v59 = vpop.eup %818  ;;  %vm426_vm8 = vcmp.lt.f32.partialorder %v1090_v14, -20.0  ;;  %v514_v57 = vmul.f32 %v1452_v31, %v1452_v31  ;;  %v515_v22 = vmul.f32 %v1454_v35, %v1454_v35 }
  0x61   :  { %1891 = vst [vmem:[#allocation20_spill] sm:$0xff] %v1634_v51  ;;  %v516_v41 = vmul.f32 %v1471_v17, %v1471_v17  ;;  %v517_v51 = vmul.f32 %v1478_v46, %v1478_v46  ;;  %v439_v33 = vmul.f32 0.6931472, %v813_v6  ;;  %826 = vlog2.f32 %v1491_v44 }
  0x62   :  { %1892 = vst [vmem:[#allocation21_spill] sm:$0xff] %v1638_v28  ;;  %v821_v28 = vpop.eup %820  ;;  %v519_v15 = vmul.f32 %v1495_v18, %v1495_v18  ;;  %v441_v31 = vmul.f32 0.6931472, %v815_v43  ;;  %v443_v27 = vmul.f32 0.6931472, %v817_v23  ;;  %v466_v35 = vsel %vm418_vm0, %v1069_v0, %v435_v19 }
  0x63   :  { %1893 = vst [vmem:[#allocation22_spill] sm:$0xff] %v1642_v52  ;;  %v518_v52 = vmul.f32 %v1484_v8, %v1484_v8  ;;  %v520_v17 = vmul.f32 %v1506_v38, %v1506_v38  ;;  %v823_v46 = vpop.eup %822  ;;  %vm427_vm9 = vcmp.lt.f32.partialorder %v1874_v48, -20.0  ;;  %v445_v6 = vmul.f32 0.6931472, %v819_v59 }
  0x64   :  { %828 = vlog2.f32 %v1502_v62  ;;  %v467_v8 = vsel %vm419_vm1, %v1071_v1, %v437_v58  ;;  %v521_v44 = vmul.f32 %v1517_v26, %v1517_v26  ;;  %v825_v18 = vpop.eup %824  ;;  %v447_v43 = vmul.f32 0.6931472, %v821_v28 }
  0x65   :  { %830 = vlog2.f32 %v1513_v12  ;;  %v530_v0 = vadd.f32 %v514_v57, %v498_v39  ;;  %v531_v19 = vadd.f32 %v515_v22, %v499_v50  ;;  %v468_v38 = vsel %vm420_vm2, %v1073_v2, %v439_v33 }
  0x66   :  { %832 = vlog2.f32 %v1523_v49  ;;  %v482_v62 = vsub.f32 0.0, %v466_v35  ;;  %v522_v23 = vmul.f32 %v1527_v40, %v1527_v40  ;;  %vm428_vm10 = vcmp.lt.f32.partialorder %v1876_v56, -20.0 }
  0x67   :  { %v449_v1 = vmul.f32 0.6931472, %v823_v46  ;;  %v469_v26 = vsel %vm421_vm3, %v1075_v3, %v441_v31  ;;  %v470_v12 = vsel %vm422_vm4, %v1078_v5, %v443_v27  ;;  %v532_v49 = vadd.f32 %v516_v41, %v500_v4  ;;  %v827_v39 = vpop.eup %826 }
  0x68   :  { %v451_v50 = vmul.f32 0.6931472, %v825_v18  ;;  %834 = vlog2.f32 %v1531_v61  ;;  %v1688_v2 = vsel %vm423_vm5, %v1081_v7, %v445_v6  ;;  %v483_v40 = vsub.f32 0.0, %v467_v8 }
  0x69   :  { %vm429_vm11 = vcmp.lt.f32.partialorder %v1878_v36, -20.0  ;;  %v1694_v3 = vsel %vm424_vm6, %v1084_v9, %v447_v43  ;;  %v533_v5 = vadd.f32 %v517_v51, %v1589_v24  ;;  %v546_v27 = vmul.f32 0.5, %v530_v0 }
  0x6a   :  { %v547_v33 = vmul.f32 0.5, %v531_v19  ;;  %v829_v4 = vpop.eup %828  ;;  %836 = vlog2.f32 %v1539_v55  ;;  %v484_v61 = vsub.f32 0.0, %v468_v38  ;;  %v485_v58 = vsub.f32 0.0, %v469_v26 }
  0x6b   :  { %v486_v28 = vsub.f32 0.0, %v470_v12  ;;  %v831_v7 = vpop.eup %830  ;;  %v453_v59 = vmul.f32 0.6931472, %v827_v39  ;;  %v1701_v57 = vsel %vm425_vm7, %v1087_v11, %v449_v1  ;;  %v534_v9 = vadd.f32 %v518_v52, %v1594_v54 }
  0x6c   :  { %v548_v22 = vmul.f32 0.5, %v532_v49  ;;  %v833_v41 = vpop.eup %832  ;;  %838 = vlog2.f32 %v1547_v16  ;;  %v1708_v55 = vsel %vm426_vm8, %v1090_v14, %v451_v50  ;;  %v487_v24 = vsub.f32 0.0, %v1688_v2 }
  0x6d   :  { %v488_v51 = vsub.f32 0.0, %v1694_v3  ;;  %vm430_vm12 = vcmp.lt.f32.partialorder %v1880_v29, -20.0  ;;  %v535_v11 = vadd.f32 %v519_v15, %v1598_v13  ;;  %v549_v31 = vmul.f32 0.5, %v533_v5 }
  0x6e   :  { %v562_v35 = vadd.f32 %v546_v27, %v482_v62  ;;  %v563_v54 = vadd.f32 %v547_v33, %v483_v40  ;;  %v835_v52 = vpop.eup %834  ;;  %v455_v46 = vmul.f32 0.6931472, %v829_v4  ;;  %v489_v16 = vsub.f32 0.0, %v1701_v57 }
  0x6f   :  { %v523_v6 = vmul.f32 %v1535_v53, %v1535_v53  ;;  %v524_v14 = vmul.f32 %v1543_v20, %v1543_v20  ;;  %v1722_v8 = vsel %vm427_vm9, %v1874_v48, %v453_v59  ;;  %v536_v13 = vadd.f32 %v520_v17, %v1602_v63 }
  0x70   :  { %v550_v15 = vmul.f32 0.5, %v534_v9  ;;  %v564_v18 = vadd.f32 %v548_v22, %v484_v61  ;;  %v837_v43 = vpop.eup %836  ;;  %v457_v0 = vmul.f32 0.6931472, %v831_v7  ;;  %v490_v19 = vsub.f32 0.0, %v1708_v55 }
  0x71   :  { %v525_v38 = vmul.f32 %v1551_v37, %v1551_v37  ;;  %v537_v53 = vadd.f32 %v521_v44, %v1606_v60  ;;  %vm431_vm13 = vcmp.lt.f32.partialorder %v1882_v42, -20.0  ;;  %v551_v20 = vmul.f32 0.5, %v535_v11  ;;  %v1738_v37 = vld [vmem:[%s1798_s4] sm:$0x1]  ;;  %v1894_v11 = vld [vmem:[#allocation17_spill] sm:$0xff] }
  0x72   :  { %v565_v62 = vadd.f32 %v549_v31, %v485_v58  ;;  %v716_v1 = vadd.f32 -0.5, %v562_v35  ;;  %v717_v48 = vadd.f32 -0.5, %v563_v54  ;;  %v839_v26 = vpop.eup %838  ;;  %v459_v12 = vmul.f32 0.6931472, %v833_v41 }
  0x73   :  { %v476_v63 = vsel %vm428_vm10, %v1876_v56, %v455_v46  ;;  %v491_v17 = vsub.f32 0.0, %v1722_v8  ;;  %v538_v49 = vadd.f32 %v522_v23, %v1612_v47  ;;  %vm432_vm14 = vcmp.lt.f32.partialorder %v1884_v45, -20.0 }
  0x74   :  { %v526_v60 = vmul.f32 %v1555_v10, %v1555_v10  ;;  %v552_v44 = vmul.f32 0.5, %v536_v13  ;;  %v566_v39 = vadd.f32 %v550_v15, %v486_v28  ;;  %v718_v50 = vadd.f32 -0.5, %v564_v18 }
  0x75   :  { %v461_v2 = vmul.f32 0.6931472, %v835_v52  ;;  %v477_v56 = vsel %vm429_vm11, %v1878_v36, %v457_v0  ;;  %v539_v47 = vadd.f32 %v523_v6, %v1616_v21  ;;  %v553_v23 = vmul.f32 0.5, %v537_v53 }
  0x76   :  { %vm433_vm15 = vcmp.lt.f32.partialorder %v1886_v34, -20.0  ;;  %v567_v40 = vadd.f32 %v551_v20, %v487_v24  ;;  %v719_v3 = vadd.f32 -0.5, %v565_v62  ;;  %v595_v5 = vadd.f32 %v717_v48, %v716_v1 }
  0x77   :  { %v615_v27 = vand.u32 2147483647, %v1738_v37  ;;  %v492_v33 = vsub.f32 0.0, %v476_v63  ;;  %v527_v10 = vmul.f32 %v1559_v25, %v1559_v25  ;;  %v540_v4 = vadd.f32 %v524_v14, %v1620_v32  ;;  %v1897_v14 = vld [vmem:[#allocation20_spill] sm:$0xff] }
  0x78   :  { %v554_v61 = vmul.f32 0.5, %v538_v49  ;;  %v568_v58 = vadd.f32 %v552_v44, %v488_v51  ;;  %v720_v28 = vadd.f32 -0.5, %v566_v39  ;;  %v596_v36 = vadd.f32 %v718_v50, %v595_v5  ;;  %v1895_v51 = vld [vmem:[#allocation19_spill] sm:$0xff] }
  0x79   :  { %v616_v7 = vsub.f32 0.0, %v615_v27  ;;  %v463_v21 = vmul.f32 0.6931472, %v837_v43  ;;  %v478_v59 = vsel %vm430_vm12, %v1880_v29, %v459_v12  ;;  %v541_v57 = vadd.f32 %v525_v38, %v1625_v30  ;;  %v1896_v30 = vld [vmem:[#allocation18_spill] sm:$0xff]  ;;  %v1898_v38 = vld [vmem:[#allocation21_spill] sm:$0xff] }
  0x7a   :  { %v555_v9 = vmul.f32 0.5, %v539_v47  ;;  %v569_v22 = vadd.f32 %v553_v23, %v489_v16  ;;  %v721_v41 = vadd.f32 -0.5, %v567_v40  ;;  %v597_v55 = vadd.f32 %v719_v3, %v596_v36  ;;  %v1899_v12 = vld [vmem:[#allocation22_spill] sm:$0xff] }
  0x7b   :  { %v617_v24 = vmul.f32 1.442695, %v616_v7  ;;  %v493_v25 = vsub.f32 0.0, %v477_v56  ;;  %v528_v32 = vmul.f32 %v1894_v11, %v1894_v11  ;;  %v542_v31 = vadd.f32 %v526_v60, %v1895_v51  ;;  %v612_v11 = vld [vmem:[%s1797_s3] sm:$0x1]  ;;  %s1003_s3 = smov [#allocation10]  }
  0x7c   :  { %v556_v35 = vmul.f32 0.5, %v540_v4  ;;  %v570_v54 = vadd.f32 %v554_v61, %v490_v19  ;;  %v722_v52 = vadd.f32 -0.5, %v568_v58  ;;  %v598_v46 = vadd.f32 %v720_v28, %v597_v55  ;;  %v629_v51 = vld [vmem:[%s1799_s5] sm:$0x1]  ;;  %s683_s5 = sshll.u32 %s1003_s3, 4  ;;  %s684_s5 = int_to_ptr.vmem [resolvable:$true] %s683_s5 }
  0x7d   :  { %840 = vpow2.f32 %v617_v24  ;;  %v465_v6 = vmul.f32 0.6931472, %v839_v26  ;;  %v479_v29 = vsel %vm431_vm13, %v1882_v42, %v461_v2  ;;  %v529_v16 = vmul.f32 %v1896_v30, %v1896_v30 }
  0x7e   :  { %v543_v8 = vadd.f32 %v527_v10, %v1897_v14  ;;  %v557_v13 = vmul.f32 0.5, %v541_v57  ;;  %v571_v15 = vadd.f32 %v555_v9, %v491_v17  ;;  %v723_v18 = vadd.f32 -0.5, %v569_v22 }
  0x7f   :  { %v599_v43 = vadd.f32 %v721_v41, %v598_v46  ;;  %v480_v0 = vsel %vm432_vm14, %v1884_v45, %v463_v21  ;;  %v494_v19 = vsub.f32 0.0, %v478_v59  ;;  %v544_v53 = vadd.f32 %v528_v32, %v1898_v38 }
  0x80   :  { %v558_v20 = vmul.f32 0.5, %v542_v31  ;;  %v572_v62 = vadd.f32 %v556_v35, %v492_v33  ;;  %v724_v1 = vadd.f32 -0.5, %v570_v54  ;;  %v481_v48 = vsel %vm433_vm15, %v1886_v34, %v465_v6 }
  0x81   :  { %v600_v42 = vadd.f32 %v722_v52, %v599_v43  ;;  %v495_v26 = vsub.f32 0.0, %v479_v29  ;;  %v545_v63 = vadd.f32 %v529_v16, %v1899_v12  ;;  %v559_v49 = vmul.f32 0.5, %v543_v8 }
  0x82   :  { %v573_v60 = vadd.f32 %v557_v13, %v493_v25  ;;  %v725_v44 = vadd.f32 -0.5, %v571_v15  ;;  %v496_v45 = vsub.f32 0.0, %v480_v0  ;;  %v560_v56 = vmul.f32 0.5, %v544_v53 }
  0x83   :  { %v841_v17 = vpop.eup %840  ;;  %v601_v39 = vadd.f32 %v723_v18, %v600_v42  ;;  %v574_v47 = vadd.f32 %v558_v20, %v494_v19  ;;  %v726_v23 = vadd.f32 -0.5, %v572_v62  ;;  %v497_v3 = vsub.f32 0.0, %v481_v48 }
  0x84   :  { %v619_v50 = vadd.f32 1.0, %v841_v17  ;;  %v622_v2 = vmul.f32 -0.5, %v841_v17  ;;  %v561_v5 = vmul.f32 0.5, %v545_v63  ;;  %v575_v27 = vadd.f32 %v559_v49, %v495_v26 }
  0x85   :  { %v602_v40 = vadd.f32 %v724_v1, %v601_v39  ;;  %v727_v34 = vadd.f32 -0.5, %v573_v60  ;;  %v625_v4 = vand.u32 2147483647, %v841_v17  ;;  %v576_v61 = vadd.f32 %v560_v56, %v496_v45 }
  0x86   :  { %842 = vlog2.f32 %v619_v50  ;;  %v623_v10 = vadd.f32 1.0, %v622_v2  ;;  %v728_v58 = vadd.f32 -0.5, %v574_v47  ;;  %v577_v36 = vadd.f32 %v561_v5, %v497_v3 }
  0x87   :  { %v603_v33 = vadd.f32 %v725_v44, %v602_v40  ;;  %v729_v7 = vadd.f32 -0.5, %v575_v27  ;;  %v614_v9 = vmax.f32 %v1738_v37, 0.0  ;;  %vm626_vm0 = vcmp.lt.f32.partialorder %v625_v4, 0.0004427343 }
  0x88   :  { %v624_v59 = vmul.f32 %v841_v17, %v623_v10  ;;  %v730_v22 = vadd.f32 -0.5, %v576_v61  ;;  %v731_v24 = vadd.f32 -0.5, %v577_v36  ;;  %v642_v46 = vmul.f32 %v612_v11, %v612_v11 }
  0x89   :  { %v604_v28 = vadd.f32 %v726_v23, %v603_v33  ;;  %vm636_vm1 = vcmp.lt.f32.partialorder %v1738_v37, -20.0  ;;  %vm663_vm2 = vcmask 0  }
  0x8b   :  { %v605_v21 = vadd.f32 %v727_v34, %v604_v28 }
  0x8c   :  { %v843_v57 = vpop.eup %842 }
  0x8d   :  { %v606_v41 = vadd.f32 %v728_v58, %v605_v21  ;;  %v621_v55 = vmul.f32 0.6931472, %v843_v57 }
  0x8f   :  { %v607_v25 = vadd.f32 %v729_v7, %v606_v41  ;;  %v627_v32 = vsel %vm626_vm0, %v624_v59, %v621_v55 }
  0x90   :  { %v628_v31 = vadd.f32 %v627_v32, %v614_v9 }
  0x91   :  { %v608_v35 = vadd.f32 %v730_v22, %v607_v25 }
  0x92   :  { %v630_v54 = vmul.f32 %v629_v51, %v628_v31  ;;  %844 = vlog2.f32 %v628_v31  ;;  %v641_v52 = vmul.f32 %v628_v31, %v628_v31 }
  0x93   :  { %v609_v6 = vadd.f32 %v731_v24, %v608_v35 }
  0x94   :  { %v631_v29 = vadd.f32 %v630_v54, %v612_v11  ;;  %v643_v30 = vadd.f32 %v642_v46, %v641_v52 }
  0x95   :  { %611 = vst [vmem:[#allocation2] sm:$0xff] %v609_v6 }
  0x96   :  { %632 = vst [vmem:[#allocation10] sm:$0x1] %v631_v29  ;;  %v644_v8 = vmul.f32 0.5, %v643_v30 }
  0x97   :  { %688 = dma.vmem_to_hbm [thread:$0]  %s684_s5, 16, %s686_s26, [#allocation11]  }
  0x98   :  { %v845_v16 = vpop.eup %844 }
  0x99   :  { %v638_v14 = vmul.f32 0.6931472, %v845_v16 }
  0x9b   :  { %v639_v13 = vsel %vm636_vm1, %v1738_v37, %v638_v14 }
  0x9c   :  { %v640_v15 = vsub.f32 0.0, %v639_v13  ;;  %v647_v43 = vld [vmem:[#allocation2] sm:$0x1] }
  0x9e   :  { %v645_v18 = vadd.f32 %v644_v8, %v640_v15 }
  0xa0   :  { %v732_v0 = vadd.f32 -0.5, %v645_v18 }
  0xa2   :  { %v648_v19 = vadd.f32 %v732_v0, %v647_v43 }
  0xa4   :  { %649 = vst [vmem:[#allocation2] sm:$0x1] %v648_v19 }
  0xab   :  { %v652_v38 = vld [vmem:[#allocation2] sm:$0xff] }
  0xac   :  { %653 = vadd.xlane.f32.xlu0 %v652_v38 }
 0x11f   :  { %v654_v37 = vpop.xlane.xlu0 %653 }
 0x120   :  { %v655_v53 = vrot.slane %v654_v37, 4 }
 0x122   :  { %v656_v20 = vadd.f32 %v655_v53, %v654_v37 }
 0x124   :  { %v657_v62 = vrot.slane %v656_v20, 2 }
 0x126   :  { %v658_v1 = vadd.f32 %v657_v62, %v656_v20 }
 0x128   :  { %v659_v42 = vrot.slane %v658_v1, 1 }
 0x12a   :  { %v660_v48 = vadd.f32 %v659_v42, %v658_v1 }
 0x12c   :  { %733 = vpush %v660_v48 }
 0x15d   :  { %s734_s15 = spop %733 }
 0x15e   :  { %v662_v26 = vstv %s734_s15 }
 0x15f   :  { %664 = vst.msk [vmem:[#allocation12] sm:$0x1] %vm663_vm2, %v662_v26 }
 0x160   :  { %699 = dma.vmem_to_hbm [thread:$0]  %s695_s10, 16, %s697_s12, [#allocation11]  }
 0x161   :  { %994 = dma.done.wait [#allocation5], 2048  }
 0x162   :  { %995 = vsyncadd [#allocation5], 4294965248 }
 0x163   :  { %996 = dma.done.wait [#allocation11], 32  }
 0x164   :  { %997 = vsyncadd [#allocation11], 4294967264 }
 0x165   :  { %712 = vsyncpa [#allocation4], 1 }
 0x166   :  { %713 = vsyncpa [#allocation7], 1 }
 0x167   :  { %714 = vsyncpa [#allocation5], 1 }
 0x168   :  { %715 = vsyncpa [#allocation11], 1 }

</bundles_post_ra>
